<compile_context>
chip_gen: v6e
topology: v6e:2x2x1
jax: 0.10.0
libtpu: 0.0.40
codegen_flags: <defaults>
</compile_context>

<pallas_src>
import functools

import numpy as np
import jax
import jax.numpy as jnp
from jax.experimental import pallas as pl
from jax.experimental.pallas import tpu as pltpu


NUM_CLASSES = 7
HEAD_PAD = 128          # classifier output padded to a full lane tile


# ----------------------------------------------------------------------------
# Fused Pallas kernel: conv3x3(pad=1) + ReLU + avgpool2x2 + folded Linear heads
# ----------------------------------------------------------------------------
def _fused_cnn_kernel(x3_ref, wconv_ref, bconv_ref, pcol_ref, prow_ref,
                      whead_ref, bhead_ref, o_ref, *, hp, wpc, npad):
    """All-VMEM fused forward pass (single grid point).

    Layouts (2-D, lane dense):
      x3_ref    : (r2, 3*(w+2)*c)      bf16  padded input, 3 row-shifts concatenated on lanes
      wconv_ref : (3*(w+2)*c, w*cout)  bf16  banded conv weight (row-stacked di slabs)
      bconv_ref : (1, w*cout)          f32   conv bias tiled over w
      pcol_ref  : (w*cout, wp*cout)    f32   width-pool selector (0/1)
      prow_ref  : (hp*npad, r2)        f32   height-pool selector (x0.25), row = ph*npad + image
      whead_ref : (hp*wp*cout, 128)    f32   folded (output @ classifier) weight, zero padded
      bhead_ref : (1, 128)             f32   folded head bias, zero padded
      o_ref     : (npad, 128)          f32   padded logits (rows >= n and cols >= 7 unused)
    """
    # --- 3x3 conv (pad=1): ONE aligned MXU matmul, K = 3*(w+2)*c --------------
    z = jnp.dot(x3_ref[...], wconv_ref[...], preferred_element_type=jnp.float32)
    z = jnp.maximum(z + bconv_ref[...], 0.0)                   # (r2, w*cout) f32

    # --- 2x2 average pool as two constant selector matmuls (f32, no re-round) -
    zc = jnp.dot(z, pcol_ref[...], preferred_element_type=jnp.float32)       # (r2, wp*cout)
    pooled = jnp.dot(prow_ref[...], zc, preferred_element_type=jnp.float32)  # (hp*npad, wp*cout)

    # --- folded head: logits = flatten(pooled) @ (out_w @ cls_w) + bias -------
    # Block decomposition of the (n, flat_dim) @ (flat_dim, 128) dot using
    # sublane-aligned slices (npad and wpc are multiples of 8); no VMEM scratch.
    acc = jnp.zeros((npad, HEAD_PAD), jnp.float32)
    for ph in range(hp):
        blk = pooled[ph * npad:(ph + 1) * npad, :]             # (npad, wp*cout), aligned
        wb = whead_ref[ph * wpc:(ph + 1) * wpc, :]             # (wp*cout, 128), aligned
        acc = acc + jnp.dot(blk, wb, preferred_element_type=jnp.float32)
    o_ref[...] = acc + bhead_ref[...]


# ----------------------------------------------------------------------------
# One-time parameter preprocessing (host-side; NOT in the per-call jit path)
# ----------------------------------------------------------------------------
def prepare_params(params, input_shape):
    """Precompute every parameter-derived constant the kernel consumes.

    Runs once per (params, input shape); nothing here is retraced or re-executed
    per forward call.
    """
    n, c, h, w = input_shape
    conv_w = np.asarray(params["conv_w"], np.float32)      # (9*c, cout), row = (di*3+dj)*c + cc
    conv_b = np.asarray(params["conv_b"], np.float32)
    out_w = np.asarray(params["out_w"], np.float32)
    out_b = np.asarray(params["out_b"], np.float32)
    cls_w = np.asarray(params["cls_w"], np.float32)
    cls_b = np.asarray(params["cls_b"], np.float32)

    cout = conv_w.shape[1]
    assert conv_w.shape[0] == 9 * c
    assert h % 2 == 0 and w % 2 == 0
    hp, wp = h // 2, w // 2
    flat_dim = hp * wp * cout
    assert out_w.shape[0] == flat_dim
    npad = ((n + 7) // 8) * 8            # pooled rows per ph-block, padded for alignment
    r2 = n * (h + 2) - 2                 # conv-output rows (incl. unused boundary rows)

    # Banded ("block-Toeplitz") conv weight; the three di slabs are stacked along
    # rows to match the lane-concatenated shifted input x3.
    wc4 = conv_w.reshape(3, 3, c, cout)
    wconv = np.zeros((3 * (w + 2) * c, w * cout), np.float32)
    for di in range(3):
        base = di * (w + 2) * c
        for dj in range(3):
            for wo in range(w):
                r0 = base + (wo + dj) * c
                wconv[r0:r0 + c, wo * cout:(wo + 1) * cout] += wc4[di, dj]
    bconv = np.tile(conv_b, w).reshape(1, w * cout)

    # 2x2 average-pool selectors.
    pcol = np.zeros((w * cout, wp * cout), np.float32)
    eye_c = np.eye(cout, dtype=np.float32)
    for wo in range(w):
        pw = wo // 2
        pcol[wo * cout:(wo + 1) * cout, pw * cout:(pw + 1) * cout] += eye_c

    prow = np.zeros((hp * npad, r2), np.float32)     # row = ph*npad + image (zero-padded)
    for ph in range(hp):
        for nn in range(n):
            r = nn * (h + 2) + 2 * ph
            prow[ph * npad + nn, r] = 0.25
            prow[ph * npad + nn, r + 1] = 0.25

    # Fold `output` (flat -> 1000) and `classifier` (1000 -> 7): exact (no
    # nonlinearity between them); done ONCE here, not per call.
    # TODO(synk): flatten order is pooled-NHWC; porting real pretrained `output`
    # weights (NCHW flatten) requires permuting w_fold's rows accordingly.
    w_fold = out_w @ cls_w                           # (flat_dim, 7)
    b_fold = out_b @ cls_w + cls_b                   # (7,)
    whead = np.zeros((flat_dim, HEAD_PAD), np.float32)
    whead[:, :NUM_CLASSES] = w_fold
    bhead = np.zeros((1, HEAD_PAD), np.float32)
    bhead[0, :NUM_CLASSES] = b_fold

    return {
        "wconv": jnp.asarray(wconv, jnp.bfloat16),   # (3*(w+2)*c, w*cout)
        "bconv": jnp.asarray(bconv, jnp.float32),    # (1, w*cout)
        "pcol":  jnp.asarray(pcol, jnp.float32),     # (w*cout, wp*cout)
        "prow":  jnp.asarray(prow, jnp.float32),     # (hp*npad, r2)
        "whead": jnp.asarray(whead, jnp.float32),    # (flat_dim, 128)
        "bhead": jnp.asarray(bhead, jnp.float32),    # (1, 128)
    }


# ----------------------------------------------------------------------------
# Parameters and forward wrappers
# ----------------------------------------------------------------------------
def init_params(key, in_ch=3, conv_ch=8, spatial=16, out_dim=1000, n_classes=NUM_CLASSES):
    flat_dim = conv_ch * (spatial // 2) * (spatial // 2)
    k1, k2, k3, k4, k5, k6 = jax.random.split(key, 6)
    return {
        # conv weight in im2col layout: (KH*KW*Cin, Cout), row = (di*3+dj)*Cin + c
        "conv_w": jax.random.normal(k1, (9 * in_ch, conv_ch), jnp.float32) * 0.05,
        "conv_b": jax.random.normal(k2, (conv_ch,), jnp.float32) * 0.01,
        # `output` head: Linear(flat_dim -> 1000)
        "out_w": jax.random.normal(k3, (flat_dim, out_dim), jnp.float32) * 0.02,
        "out_b": jax.random.normal(k4, (out_dim,), jnp.float32) * 0.01,
        # `classifier`: Linear(1000 -> 7)
        "cls_w": jax.random.normal(k5, (out_dim, n_classes), jnp.float32) * 0.02,
        "cls_b": jax.random.normal(k6, (n_classes,), jnp.float32) * 0.01,
    }


@jax.jit
def cnn_forward(x_nchw, prep):
    n, c, h, w = x_nchw.shape
    hp, wp = h // 2, w // 2
    wcout = prep["wconv"].shape[1]
    cout = wcout // w
    wpc = wp * cout
    flat_dim = hp * wpc
    npad = prep["prow"].shape[0] // hp
    r2 = n * (h + 2) - 2

    # Per-call work is only cheap activation layout glue (parameter prep is all
    # in prepare_params): NCHW -> NHWC bf16, pad=1, collapse to 2-D, and
    # lane-concatenate the three row shifts so the conv is one aligned matmul.
    x = jnp.transpose(x_nchw.astype(jnp.bfloat16), (0, 2, 3, 1))
    xp = jnp.pad(x, ((0, 0), (1, 1), (1, 1), (0, 0)))
    x2 = xp.reshape(n * (h + 2), (w + 2) * c)
    x3 = jnp.concatenate([x2[di:di + r2, :] for di in range(3)], axis=1)

    kernel = functools.partial(_fused_cnn_kernel, hp=hp, wpc=wpc, npad=npad)

    def full(shape):
        return pl.BlockSpec(shape, lambda: (0,) * len(shape))

    flops = (2 * r2 * (3 * (w + 2) * c) * wcout        # conv
             + 2 * r2 * wcout * wpc                    # column pool
             + 2 * (hp * npad) * r2 * wpc              # row pool
             + 2 * hp * npad * wpc * HEAD_PAD)         # folded head
    bytes_accessed = (int(x3.size) * 2 + int(prep["wconv"].size) * 2
                      + 4 * (int(prep["bconv"].size) + int(prep["pcol"].size)
                             + int(prep["prow"].size) + int(prep["whead"].size)
                             + int(prep["bhead"].size) + npad * HEAD_PAD))

    # Single fused kernel, single grid point; every buffer is tiny (<0.5 MiB).
    # TODO(synk): for real backbone resolutions / large batches, add a grid over
    # row-blocks of x3 with dimension_semantics=("parallel",) (2 TCs on v7x) and
    # re-derive the VMEM budget (64 MiB physical on v7x, 128 MiB on v5e/v6e).
    padded = pl.pallas_call(
        kernel,
        out_shape=jax.ShapeDtypeStruct((npad, HEAD_PAD), jnp.float32),
        in_specs=[
            full((r2, 3 * (w + 2) * c)),       # x3
            full((3 * (w + 2) * c, wcout)),    # banded conv weight
            full((1, wcout)),                  # conv bias (tiled)
            full((wcout, wpc)),                # column-pool selector
            full((hp * npad, r2)),             # row-pool selector
            full((flat_dim, HEAD_PAD)),        # folded head weight
            full((1, HEAD_PAD)),               # folded head bias
        ],
        out_specs=full((npad, HEAD_PAD)),
        cost_estimate=pl.CostEstimate(flops=flops, transcendentals=0,
                                      bytes_accessed=bytes_accessed),
        compiler_params=pltpu.CompilerParams(vmem_limit_bytes=16 * 1024 * 1024),
    )(x3, prep["wconv"], prep["bconv"], prep["pcol"], prep["prow"],
      prep["whead"], prep["bhead"])

    return padded[:n, :NUM_CLASSES]                    # (n, 7)


# ----------------------------------------------------------------------------
# Pure-JAX (f32) reference for validation
# ----------------------------------------------------------------------------
def cnn_forward_reference(x_nchw, params):
    x = jnp.transpose(x_nchw, (0, 2, 3, 1)).astype(jnp.float32)
    n, h, w, c = x.shape
    xp = jnp.pad(x, ((0, 0), (1, 1), (1, 1), (0, 0)))
    cols = [xp[:, i:i + h, j:j + w, :] for i in range(3) for j in range(3)]
    patches = jnp.concatenate(cols, axis=-1).reshape(n * h * w, 9 * c)
    cout = params["conv_w"].shape[1]
    conv = jnp.maximum(patches @ params["conv_w"] + params["conv_b"], 0.0)
    conv = conv.reshape(n, h, w, cout)
    pooled = 0.25 * (conv[:, 0::2, 0::2, :] + conv[:, 1::2, 0::2, :]
                     + conv[:, 0::2, 1::2, :] + conv[:, 1::2, 1::2, :])
    feat = pooled.reshape(n, -1)
    out = feat @ params["out_w"] + params["out_b"]
    return out @ params["cls_w"] + params["cls_b"]


# ----------------------------------------------------------------------------
if __name__ == "__main__":
    key = jax.random.PRNGKey(0)
    pkey, xkey = jax.random.split(key)

    params = init_params(pkey, in_ch=3, conv_ch=8, spatial=16)
    x = jax.random.normal(xkey, (2, 3, 16, 16), jnp.float32)         # NCHW input

    # One-time preprocessing of the parameters (outside the per-call hot path).
    prep = prepare_params(params, x.shape)

    logits = cnn_forward(x, prep)
    jax.block_until_ready(logits)

    assert logits.shape == (2, NUM_CLASSES), logits.shape
    assert logits.dtype == jnp.float32

    ref = cnn_forward_reference(x, params)
    err = float(jnp.max(jnp.abs(logits - ref)))
    scale = float(jnp.max(jnp.abs(ref))) + 1e-6
    assert err <= 0.05 * scale + 2e-3, (err, scale)    # bf16-conv tolerance

    print("KERNEL_OK")
</pallas_src>

<mosaic_0001>
module attributes {stable_mosaic.version = 11 : i64} {
  func.func @_fused_cnn_kernel(%arg0: memref<34x162xbf16, #tpu.memory_space<vmem>>, %arg1: memref<162x128xbf16, #tpu.memory_space<vmem>>, %arg2: memref<1x128xf32, #tpu.memory_space<vmem>>, %arg3: memref<128x64xf32, #tpu.memory_space<vmem>>, %arg4: memref<64x34xf32, #tpu.memory_space<vmem>>, %arg5: memref<512x128xf32, #tpu.memory_space<vmem>>, %arg6: memref<1x128xf32, #tpu.memory_space<vmem>>, %arg7: memref<8x128xf32, #tpu.memory_space<vmem>>) attributes {dimension_semantics = [], scalar_prefetch = 0 : i64, scratch_operands = 0 : i64, tpu.core_type = #tpu.core_type<tc>} {
    %c0 = arith.constant 0 : index
    %c0_0 = arith.constant 0 : index
    %0 = vector.load %arg0[%c0, %c0_0] : memref<34x162xbf16, #tpu.memory_space<vmem>>, vector<34x162xbf16>
    %c0_1 = arith.constant 0 : index
    %c0_2 = arith.constant 0 : index
    %1 = vector.load %arg1[%c0_1, %c0_2] : memref<162x128xbf16, #tpu.memory_space<vmem>>, vector<162x128xbf16>
    %cst = arith.constant dense<0.000000e+00> : vector<34x128xf32>
    %2 = tpu.matmul %0, %1, %cst {dimension_numbers = #tpu.dot_dimension_numbers<[1], [0], [0], [1], [0, 0, 1, 1], [], []>} : vector<34x162xbf16>, vector<162x128xbf16>, vector<34x128xf32> -> vector<34x128xf32>
    %c0_3 = arith.constant 0 : index
    %c0_4 = arith.constant 0 : index
    %3 = vector.load %arg2[%c0_3, %c0_4] : memref<1x128xf32, #tpu.memory_space<vmem>>, vector<1x128xf32>
    %4 = vector.broadcast %3 : vector<1x128xf32> to vector<34x128xf32>
    %5 = arith.addf %2, %4 : vector<34x128xf32>
    %cst_5 = arith.constant 0.000000e+00 : f32
    %6 = vector.broadcast %cst_5 : f32 to vector<34x128xf32>
    %7 = arith.maximumf %5, %6 : vector<34x128xf32>
    %c0_6 = arith.constant 0 : index
    %c0_7 = arith.constant 0 : index
    %8 = vector.load %arg3[%c0_6, %c0_7] : memref<128x64xf32, #tpu.memory_space<vmem>>, vector<128x64xf32>
    %cst_8 = arith.constant dense<0.000000e+00> : vector<34x64xf32>
    %9 = tpu.matmul %7, %8, %cst_8 {dimension_numbers = #tpu.dot_dimension_numbers<[1], [0], [0], [1], [0, 0, 1, 1], [], []>} : vector<34x128xf32>, vector<128x64xf32>, vector<34x64xf32> -> vector<34x64xf32>
    %c0_9 = arith.constant 0 : index
    %c0_10 = arith.constant 0 : index
    %10 = vector.load %arg4[%c0_9, %c0_10] : memref<64x34xf32, #tpu.memory_space<vmem>>, vector<64x34xf32>
    %cst_11 = arith.constant dense<0.000000e+00> : vector<64x64xf32>
    %11 = tpu.matmul %10, %9, %cst_11 {dimension_numbers = #tpu.dot_dimension_numbers<[1], [0], [0], [1], [0, 0, 1, 1], [], []>} : vector<64x34xf32>, vector<34x64xf32>, vector<64x64xf32> -> vector<64x64xf32>
    %cst_12 = arith.constant 0.000000e+00 : f32
    %12 = vector.broadcast %cst_12 : f32 to vector<8x128xf32>
    %13 = vector.extract_strided_slice %11 {offsets = [0, 0], sizes = [8, 64], strides = [1, 1]} : vector<64x64xf32> to vector<8x64xf32>
    %c0_13 = arith.constant 0 : index
    %c0_14 = arith.constant 0 : index
    %14 = vector.load %arg5[%c0_13, %c0_14] : memref<512x128xf32, #tpu.memory_space<vmem>>, vector<64x128xf32>
    %cst_15 = arith.constant dense<0.000000e+00> : vector<8x128xf32>
    %15 = tpu.matmul %13, %14, %cst_15 {dimension_numbers = #tpu.dot_dimension_numbers<[1], [0], [0], [1], [0, 0, 1, 1], [], []>} : vector<8x64xf32>, vector<64x128xf32>, vector<8x128xf32> -> vector<8x128xf32>
    %16 = arith.addf %12, %15 : vector<8x128xf32>
    %17 = vector.extract_strided_slice %11 {offsets = [8, 0], sizes = [8, 64], strides = [1, 1]} : vector<64x64xf32> to vector<8x64xf32>
    %c64 = arith.constant 64 : index
    %c0_16 = arith.constant 0 : index
    %18 = vector.load %arg5[%c64, %c0_16] : memref<512x128xf32, #tpu.memory_space<vmem>>, vector<64x128xf32>
    %cst_17 = arith.constant dense<0.000000e+00> : vector<8x128xf32>
    %19 = tpu.matmul %17, %18, %cst_17 {dimension_numbers = #tpu.dot_dimension_numbers<[1], [0], [0], [1], [0, 0, 1, 1], [], []>} : vector<8x64xf32>, vector<64x128xf32>, vector<8x128xf32> -> vector<8x128xf32>
    %20 = arith.addf %16, %19 : vector<8x128xf32>
    %21 = vector.extract_strided_slice %11 {offsets = [16, 0], sizes = [8, 64], strides = [1, 1]} : vector<64x64xf32> to vector<8x64xf32>
    %c128 = arith.constant 128 : index
    %c0_18 = arith.constant 0 : index
    %22 = vector.load %arg5[%c128, %c0_18] : memref<512x128xf32, #tpu.memory_space<vmem>>, vector<64x128xf32>
    %cst_19 = arith.constant dense<0.000000e+00> : vector<8x128xf32>
    %23 = tpu.matmul %21, %22, %cst_19 {dimension_numbers = #tpu.dot_dimension_numbers<[1], [0], [0], [1], [0, 0, 1, 1], [], []>} : vector<8x64xf32>, vector<64x128xf32>, vector<8x128xf32> -> vector<8x128xf32>
    %24 = arith.addf %20, %23 : vector<8x128xf32>
    %25 = vector.extract_strided_slice %11 {offsets = [24, 0], sizes = [8, 64], strides = [1, 1]} : vector<64x64xf32> to vector<8x64xf32>
    %c192 = arith.constant 192 : index
    %c0_20 = arith.constant 0 : index
    %26 = vector.load %arg5[%c192, %c0_20] : memref<512x128xf32, #tpu.memory_space<vmem>>, vector<64x128xf32>
    %cst_21 = arith.constant dense<0.000000e+00> : vector<8x128xf32>
    %27 = tpu.matmul %25, %26, %cst_21 {dimension_numbers = #tpu.dot_dimension_numbers<[1], [0], [0], [1], [0, 0, 1, 1], [], []>} : vector<8x64xf32>, vector<64x128xf32>, vector<8x128xf32> -> vector<8x128xf32>
    %28 = arith.addf %24, %27 : vector<8x128xf32>
    %29 = vector.extract_strided_slice %11 {offsets = [32, 0], sizes = [8, 64], strides = [1, 1]} : vector<64x64xf32> to vector<8x64xf32>
    %c256 = arith.constant 256 : index
    %c0_22 = arith.constant 0 : index
    %30 = vector.load %arg5[%c256, %c0_22] : memref<512x128xf32, #tpu.memory_space<vmem>>, vector<64x128xf32>
    %cst_23 = arith.constant dense<0.000000e+00> : vector<8x128xf32>
    %31 = tpu.matmul %29, %30, %cst_23 {dimension_numbers = #tpu.dot_dimension_numbers<[1], [0], [0], [1], [0, 0, 1, 1], [], []>} : vector<8x64xf32>, vector<64x128xf32>, vector<8x128xf32> -> vector<8x128xf32>
    %32 = arith.addf %28, %31 : vector<8x128xf32>
    %33 = vector.extract_strided_slice %11 {offsets = [40, 0], sizes = [8, 64], strides = [1, 1]} : vector<64x64xf32> to vector<8x64xf32>
    %c320 = arith.constant 320 : index
    %c0_24 = arith.constant 0 : index
    %34 = vector.load %arg5[%c320, %c0_24] : memref<512x128xf32, #tpu.memory_space<vmem>>, vector<64x128xf32>
    %cst_25 = arith.constant dense<0.000000e+00> : vector<8x128xf32>
    %35 = tpu.matmul %33, %34, %cst_25 {dimension_numbers = #tpu.dot_dimension_numbers<[1], [0], [0], [1], [0, 0, 1, 1], [], []>} : vector<8x64xf32>, vector<64x128xf32>, vector<8x128xf32> -> vector<8x128xf32>
    %36 = arith.addf %32, %35 : vector<8x128xf32>
    %37 = vector.extract_strided_slice %11 {offsets = [48, 0], sizes = [8, 64], strides = [1, 1]} : vector<64x64xf32> to vector<8x64xf32>
    %c384 = arith.constant 384 : index
    %c0_26 = arith.constant 0 : index
    %38 = vector.load %arg5[%c384, %c0_26] : memref<512x128xf32, #tpu.memory_space<vmem>>, vector<64x128xf32>
    %cst_27 = arith.constant dense<0.000000e+00> : vector<8x128xf32>
    %39 = tpu.matmul %37, %38, %cst_27 {dimension_numbers = #tpu.dot_dimension_numbers<[1], [0], [0], [1], [0, 0, 1, 1], [], []>} : vector<8x64xf32>, vector<64x128xf32>, vector<8x128xf32> -> vector<8x128xf32>
    %40 = arith.addf %36, %39 : vector<8x128xf32>
    %41 = vector.extract_strided_slice %11 {offsets = [56, 0], sizes = [8, 64], strides = [1, 1]} : vector<64x64xf32> to vector<8x64xf32>
    %c448 = arith.constant 448 : index
    %c0_28 = arith.constant 0 : index
    %42 = vector.load %arg5[%c448, %c0_28] : memref<512x128xf32, #tpu.memory_space<vmem>>, vector<64x128xf32>
    %cst_29 = arith.constant dense<0.000000e+00> : vector<8x128xf32>
    %43 = tpu.matmul %41, %42, %cst_29 {dimension_numbers = #tpu.dot_dimension_numbers<[1], [0], [0], [1], [0, 0, 1, 1], [], []>} : vector<8x64xf32>, vector<64x128xf32>, vector<8x128xf32> -> vector<8x128xf32>
    %44 = arith.addf %40, %43 : vector<8x128xf32>
    %c0_30 = arith.constant 0 : index
    %c0_31 = arith.constant 0 : index
    %45 = vector.load %arg6[%c0_30, %c0_31] : memref<1x128xf32, #tpu.memory_space<vmem>>, vector<1x128xf32>
    %46 = vector.broadcast %45 : vector<1x128xf32> to vector<8x128xf32>
    %47 = arith.addf %44, %46 : vector<8x128xf32>
    %c0_32 = arith.constant 0 : index
    %c0_33 = arith.constant 0 : index
    %48 = vector.load %arg7[%c0_32, %c0_33] : memref<8x128xf32, #tpu.memory_space<vmem>>, vector<8x128xf32>
    tpu.vector_store %arg7[%c0_32, %c0_33], %47 {strides = array<i32>} : memref<8x128xf32, #tpu.memory_space<vmem>>, vector<8x128xf32>,
    return
  }
}

</mosaic_0001>

<bundles_post_ra>
// kernel: cnn_forward.1
= control target key start
LH: loop header
LB: loop body
LE: loop exit
PB: predicated region body
PF: predicated region fallthrough
CT: control target
= control target key end

     0   :  { %v1525_v0 = vmov 0   ;;  %v1526_v2 = vmov 0.0   ;;  %vm147_vm0 = vcmask 277504   ;;  %vm157_vm1 = vcmask 1040384   ;;  %s2025_s1 = inlined_call_operand.vmem [shape: bf16[162,128], index: 1, kind: input, shape index: {}]   ;;  %s2026_s0 = inlined_call_operand.vmem [shape: bf16[34,162], index: 0, kind: input, shape index: {}]   ;;  %s2027_s3 = inlined_call_operand.vmem [shape: f32[128,64], index: 3, kind: input, shape index: {}]   ;;  %s2028_s2 = inlined_call_operand.vmem [shape: f32[1,128], index: 2, kind: input, shape index: {}]   ;;  %s2029_s4 = inlined_call_operand.vmem [shape: f32[64,34], index: 4, kind: input, shape index: {}]   ;;  %s2030_s5 = inlined_call_operand.vmem [shape: f32[512,128], index: 5, kind: input, shape index: {}]   ;;  %s2031_s6 = inlined_call_operand.vmem [shape: f32[1,128], index: 6, kind: input, shape index: {}]   ;;  %s2032_s7 = inlined_call_operand.vmem [shape: f32[8,128], index: 7, kind: output, shape index: {}]  }
   0x1   :  { %161 = vmatprep.subr.bf16.mxu0 %v1525_v0  ;;  %v1506_v1 = vld [vmem:[%s2025_s1 + $0x38] sm:$0xff]   ;;  %1282 = vmatprep.subr.mxu1 %v1526_v2  ;;  %v1507_v3 = vld [vmem:[%s2025_s1 + $0x30] sm:$0xff]   ;;  %v1508_v4 = vld [vmem:[%s2025_s1 + $0x28] sm:$0xff]   ;;  %vm1527_vm2 = vmmov 0   ;;  %vm360_vm3 = vcmask 1041408   ;;  %vm485_vm4 = vcmask 523264  }
   0x2   :  { %162 = vmatpush1.bf16.msra.mxu0 %v1506_v1  ;;  %v1509_v5 = vld [vmem:[%s2025_s1 + $0x20] sm:$0xff]   ;;  %v237_v7 = vld [vmem:[%s2027_s3 + $0x78] sm:$0xff]  ;;  %v236_v9 = vld [vmem:[%s2027_s3 + $0x70] sm:$0xff]  ;;  %1314 = vmatprep.mubr.msk.f32.mxu1 %vm1527_vm2, %v1526_v2 }
   0x3   :  { %163 = vmatprep.subr.bf16.mxu0 %v1525_v0  ;;  %v1519_v6 = vld [vmem:[%s2026_s0 + $0x4] ss:$8 sps:$4 sm:$0xff]   ;;  %v1510_v8 = vld [vmem:[%s2025_s1 + $0x18] sm:$0xff]   ;;  %1283 = vmatpush3.msra.mxu1 %v237_v7  ;;  %v1511_v12 = vld [vmem:[%s2025_s1 + $0x10] sm:$0xff]  }
   0x4   :  { %1155 = vmatprep.mubr.msk.bf16.mxu0 %vm147_vm0, %v1519_v6  ;;  %1284 = vmatprep.subr.mxu1 %v1526_v2  ;;  %v235_v10 = vld [vmem:[%s2027_s3 + $0x68] sm:$0xff]  ;;  %v234_v11 = vld [vmem:[%s2027_s3 + $0x60] sm:$0xff]  ;;  %v233_v13 = vld [vmem:[%s2027_s3 + $0x58] sm:$0xff] }
   0x5   :  { %1285 = vmatpush3.msra.mxu1 %v236_v9  ;;  %v232_v14 = vld [vmem:[%s2027_s3 + $0x50] sm:$0xff]  ;;  %v1512_v15 = vld [vmem:[%s2025_s1 + $0x8] sm:$0xff]   ;;  %v230_v17 = vld [vmem:[%s2027_s3 + $0x40] sm:$0xff] }
   0x6   :  { %164 = vmatpush1.bf16.msra.mxu0 %v1507_v3  ;;  %1286 = vmatprep.subr.mxu1 %v1526_v2  ;;  %v231_v16 = vld [vmem:[%s2027_s3 + $0x48] sm:$0xff]  ;;  %v1513_v18 = vld [vmem:[%s2025_s1] sm:$0xff]   ;;  %v1514_v19 = vld [vmem:[%s2025_s1 + $0x50] ss:$0 sps:$4 sm:$0x11]  }
   0x7   :  { %165 = vmatprep.subr.bf16.mxu0 %v1525_v0  ;;  %1287 = vmatpush3.msra.mxu1 %v235_v10  ;;  %v229_v20 = vld [vmem:[%s2027_s3 + $0x38] sm:$0xff]  ;;  %v228_v21 = vld [vmem:[%s2027_s3 + $0x30] sm:$0xff]  ;;  %v159_v22 = vsel %vm157_vm1, %v1514_v19, 0  ;;  %v227_v23 = vld [vmem:[%s2027_s3 + $0x28] sm:$0xff] }
   0x8   :  { %1288 = vmatprep.subr.mxu1 %v1526_v2  ;;  %v226_v24 = vld [vmem:[%s2027_s3 + $0x20] sm:$0xff]  ;;  %v1515_v25 = vld [vmem:[%s2025_s1 + $0x48] sm:$0xff]   ;;  %v225_v26 = vld [vmem:[%s2027_s3 + $0x18] sm:$0xff] }
   0x9   :  { %1289 = vmatpush3.msra.mxu1 %v234_v11  ;;  %v1516_v27 = vld [vmem:[%s2025_s1 + $0x40] sm:$0xff]   ;;  %v1520_v29 = vld [vmem:[%s2026_s0 + $0x14] ss:$8 sps:$4 sm:$0xff]   ;;  %v1522_v31 = vld [vmem:[%s2026_s0 + $0x10] ss:$8 sps:$4 sm:$0xff]  }
   0xa   :  { %166 = vmatpush1.bf16.msra.mxu0 %v1508_v4  ;;  %1290 = vmatprep.subr.mxu1 %v1526_v2  ;;  %v1517_v28 = vld [vmem:[%s2026_s0] ss:$8 sps:$4 sm:$0xff]   ;;  %v224_v34 = vld [vmem:[%s2027_s3 + $0x10] sm:$0xff]  ;;  %v484_v61 = vld [vmem:[%s2030_s5 + $0x78] sm:$0xff] }
   0xb   :  { %167 = vmatprep.subr.bf16.mxu0 %v1525_v0  ;;  %1291 = vmatpush3.msra.mxu1 %v233_v13  ;;  %v31_v30 = vld [vmem:[%s2026_s0 + $0x20] sm:$0x11]  ;;  %v223_v35 = vld [vmem:[%s2027_s3 + $0x8] sm:$0xff]  ;;  %v483_v62 = vld [vmem:[%s2030_s5 + $0x70] sm:$0xff] }
   0xc   :  { %1292 = vmatprep.subr.mxu1 %v1526_v2  ;;  %v1143_v32 = vcombine.high %v31_v30, %v31_v30  ;;  %v1142_v33 = vcombine.low %v31_v30, %v31_v30  ;;  %v222_v36 = vld [vmem:[%s2027_s3] sm:$0xff]  ;;  %v482_v63 = vld [vmem:[%s2030_s5 + $0x68] sm:$0xff]  ;;  %v480_v1 = vld [vmem:[%s2030_s5 + $0x58] sm:$0xff] }
   0xd   :  { %1293 = vmatpush3.msra.mxu1 %v232_v14  ;;  %v1137_v37 = vld [vmem:[%s2028_s2] ss:$0 sm:$0xff]  ;;  %v479_v3 = vld [vmem:[%s2030_s5 + $0x50] sm:$0xff]  ;;  %v478_v4 = vld [vmem:[%s2030_s5 + $0x48] sm:$0xff] }
   0xe   :  { %168 = vmatpush1.bf16.msra.mxu0 %v1509_v5  ;;  %1294 = vmatprep.subr.mxu1 %v1526_v2  ;;  %v328_v60 = vld [vmem:[%s2029_s4] sm:$0xff]  ;;  %v475_v19 = vld [vmem:[%s2030_s5 + $0x30] sm:$0xff] }
   0xf   :  { %169 = vmatprep.subr.bf16.mxu0 %v1525_v0  ;;  %1295 = vmatpush3.msra.mxu1 %v231_v16  ;;  %v477_v5 = vld [vmem:[%s2030_s5 + $0x40] sm:$0xff]  ;;  %v329_v16 = vld [vmem:[%s2029_s4 + $0x8] sm:$0xff] }
  0x10   :  { %1296 = vmatprep.subr.mxu1 %v1526_v2  ;;  %v469_v30 = vld [vmem:[%s2030_s5] sm:$0xff] }
  0x11   :  { %1297 = vmatpush3.msra.mxu1 %v230_v17  ;;  %v330_v17 = vld [vmem:[%s2029_s4 + $0x10] sm:$0xff] }
  0x12   :  { %170 = vmatpush1.bf16.msra.mxu0 %v1510_v8  ;;  %1298 = vmatprep.subr.mxu1 %v1526_v2 }
  0x13   :  { %171 = vmatprep.subr.bf16.mxu0 %v1525_v0  ;;  %1299 = vmatpush3.msra.mxu1 %v229_v20  ;;  %v331_v20 = vld [vmem:[%s2029_s4 + $0x18] sm:$0xff] }
  0x14   :  { %1300 = vmatprep.subr.mxu1 %v1526_v2 }
  0x15   :  { %1301 = vmatpush3.msra.mxu1 %v228_v21  ;;  %v332_v21 = vld [vmem:[%s2029_s4 + $0x20] sm:$0xff] }
  0x16   :  { %172 = vmatpush1.bf16.msra.mxu0 %v1511_v12  ;;  %1302 = vmatprep.subr.mxu1 %v1526_v2 }
  0x17   :  { %173 = vmatprep.subr.bf16.mxu0 %v1525_v0  ;;  %1303 = vmatpush3.msra.mxu1 %v227_v23  ;;  %v473_v23 = vld [vmem:[%s2030_s5 + $0x20] sm:$0xff] }
  0x18   :  { %1304 = vmatprep.subr.mxu1 %v1526_v2 }
  0x19   :  { %1305 = vmatpush3.msra.mxu1 %v226_v24  ;;  %v333_v24 = vld [vmem:[%s2029_s4 + $0x28] sm:$0xff] }
  0x1a   :  { %174 = vmatpush1.bf16.msra.mxu0 %v1512_v15  ;;  %1306 = vmatprep.subr.mxu1 %v1526_v2 }
  0x1b   :  { %175 = vmatprep.subr.bf16.mxu0 %v1525_v0  ;;  %1307 = vmatpush3.msra.mxu1 %v225_v26  ;;  %v472_v26 = vld [vmem:[%s2030_s5 + $0x18] sm:$0xff] }
  0x1c   :  { %1308 = vmatprep.subr.mxu1 %v1526_v2 }
  0x1d   :  { %1309 = vmatpush3.msra.mxu1 %v224_v34  ;;  %v721_v34 = vld [vmem:[%s2030_s5 + $0xf8] sm:$0xff] }
  0x1e   :  { %176 = vmatpush1.bf16.msra.mxu0 %v1513_v18  ;;  %1310 = vmatprep.subr.mxu1 %v1526_v2  ;;  %v476_v18 = vld [vmem:[%s2030_s5 + $0x38] sm:$0xff] }
  0x1f   :  { %187 = vmatprep.subr.bf16.mxu0 %v1525_v0  ;;  %1311 = vmatpush3.msra.mxu1 %v223_v35 }
  0x20   :  { %1312 = vmatprep.subr.mxu1 %v1526_v2 }
  0x21   :  { %1313 = vmatpush3.msra.mxu1 %v222_v36  ;;  %v637_v36 = vld [vmem:[%s2030_s5 + $0xa8] sm:$0xff] }
  0x22   :  { %188 = vmatpush2.bf16.msra.mxu0 %v159_v22  ;;  %v474_v22 = vld [vmem:[%s2030_s5 + $0x28] sm:$0xff] }
  0x23   :  { %189 = vmatprep.subr.bf16.mxu0 %v1525_v0 }
  0x26   :  { %190 = vmatpush2.bf16.msra.mxu0 %v1515_v25  ;;  %v334_v25 = vld [vmem:[%s2029_s4 + $0x30] sm:$0xff] }
  0x27   :  { %191 = vmatprep.subr.bf16.mxu0 %v1525_v0  ;;  %v481_v0 = vld [vmem:[%s2030_s5 + $0x60] sm:$0xff] }
  0x2a   :  { %192 = vmatpush2.bf16.msra.mxu0 %v1516_v27  ;;  %v471_v27 = vld [vmem:[%s2030_s5 + $0x10] sm:$0xff] }
  0x2b   :  { %1351 = vmatprep.subr.mxu0 %v1526_v2 }
  0x2d   :  { %194 = vmatmul.mubr.bf16.vlgmr.msra.gmra.mxu0 %v1517_v28  ;;  %v335_v28 = vld [vmem:[%s2029_s4 + $0x38] sm:$0xff] }
  0x2e   :  { %1156 = vmatprep.mubr.msk.bf16.mxu0 %vm147_vm0, %v1520_v29  ;;  %1352 = vmatpush3.msra.mxu0 %v484_v61  ;;  %v470_v29 = vld [vmem:[%s2030_s5 + $0x8] sm:$0xff]  ;;  %v881_v61 = vld [vmem:[%s2030_s5 + $0x158] sm:$0xff] }
  0x2f   :  { %1353 = vmatprep.subr.mxu0 %v1526_v2 }
  0x30   :  { %1354 = vmatpush3.msra.mxu0 %v483_v62 }
  0x31   :  { %1355 = vmatprep.subr.mxu0 %v1526_v2 }
  0x32   :  { %1356 = vmatpush3.msra.mxu0 %v482_v63  ;;  %v797_v63 = vld [vmem:[%s2030_s5 + $0x108] sm:$0xff] }
  0x33   :  { %1357 = vmatprep.subr.mxu0 %v1526_v2 }
  0x34   :  { %1358 = vmatpush3.msra.mxu0 %v481_v0  ;;  %v880_v0 = vld [vmem:[%s2030_s5 + $0x150] sm:$0xff] }
  0x35   :  { %202 = vmatmul.mubr.bf16.gmra.mxu0 %v1522_v31  ;;  %1359 = vmatprep.subr.mxu0 %v1526_v2  ;;  %v639_v31 = vld [vmem:[%s2030_s5 + $0xb8] sm:$0xff] }
  0x36   :  { %1157 = vmatprep.mubr.msk.bf16.mxu0 %vm147_vm0, %v1143_v32  ;;  %1360 = vmatpush3.msra.mxu0 %v480_v1  ;;  %v796_v1 = vld [vmem:[%s2030_s5 + $0x100] sm:$0xff] }
  0x37   :  { %1361 = vmatprep.subr.mxu0 %v1526_v2 }
  0x38   :  { %1362 = vmatpush3.msra.mxu0 %v479_v3  ;;  %v879_v3 = vld [vmem:[%s2030_s5 + $0x148] sm:$0xff] }
  0x39   :  { %1363 = vmatprep.subr.mxu0 %v1526_v2 }
  0x3a   :  { %1364 = vmatpush3.msra.mxu0 %v478_v4 }
  0x3b   :  { %1365 = vmatprep.subr.mxu0 %v1526_v2 }
  0x3c   :  { %1366 = vmatpush3.msra.mxu0 %v477_v5  ;;  %v878_v5 = vld [vmem:[%s2030_s5 + $0x140] sm:$0xff] }
  0x3d   :  { %210 = vmatmul.mubr.bf16.gmra.mxu0 %v1142_v33  ;;  %1389 = vmatprep.subr.mxu0 %v1526_v2  ;;  %v638_v33 = vld [vmem:[%s2030_s5 + $0xb0] sm:$0xff] }
  0x3e   :  { %1367 = vmatprep.mubr.msk.f32.mxu0 %vm1527_vm2, %v1526_v2 }
  0xed   :  { %v195_v38 = vpop.f32.mrf.mxu0 }
  0xee   :  { %v196_v39 = vadd.f32 %v1137_v37, %v195_v38  ;;  %v636_v38 = vld [vmem:[%s2030_s5 + $0xa0] sm:$0xff] }
  0xef   :  { %v197_v40 = vpop.f32.mrf.mxu0 }
  0xf0   :  { %v217_v41 = vmax.f32 %v196_v39, 0.0  ;;  %v719_v39 = vld [vmem:[%s2030_s5 + $0xe8] sm:$0xff]  ;;  %v635_v40 = vld [vmem:[%s2030_s5 + $0x98] sm:$0xff] }
  0xf1   :  { %v198_v42 = vpop.f32.mrf.mxu0 }
  0xf2   :  { %v199_v43 = vadd.f32 %v1137_v37, %v198_v42  ;;  %1315 = vmatmul.mubr.f32.vlgmr.msra.gmra.mxu1 %v217_v41  ;;  %v718_v41 = vld [vmem:[%s2030_s5 + $0xe0] sm:$0xff]  ;;  %v634_v42 = vld [vmem:[%s2030_s5 + $0x90] sm:$0xff] }
  0xf3   :  { %v200_v44 = vpop.f32.mrf.mxu0  ;;  %1317 = vmatprep.mubr.msk.f32.mxu1 %vm1527_vm2, %v1526_v2 }
  0xf4   :  { %v218_v45 = vmax.f32 %v199_v43, 0.0  ;;  %v717_v43 = vld [vmem:[%s2030_s5 + $0xd8] sm:$0xff] }
  0xf5   :  { %v203_v46 = vpop.f32.mrf.mxu0 }
  0xf6   :  { %v204_v47 = vadd.f32 %v1137_v37, %v203_v46  ;;  %1318 = vmatmul.mubr.f32.gmra.mxu1 %v218_v45  ;;  %v633_v45 = vld [vmem:[%s2030_s5 + $0x88] sm:$0xff]  ;;  %v716_v46 = vld [vmem:[%s2030_s5 + $0xd0] sm:$0xff] }
  0xf7   :  { %v205_v48 = vpop.f32.mrf.mxu0  ;;  %1320 = vmatprep.mubr.msk.f32.mxu1 %vm1527_vm2, %v1526_v2 }
  0xf8   :  { %v219_v49 = vmax.f32 %v204_v47, 0.0  ;;  %v632_v47 = vld [vmem:[%s2030_s5 + $0x80] sm:$0xff]  ;;  %v715_v48 = vld [vmem:[%s2030_s5 + $0xc8] sm:$0xff] }
  0xf9   :  { %v206_v50 = vpop.f32.mrf.mxu0 }
  0xfa   :  { %v207_v51 = vadd.f32 %v1137_v37, %v206_v50  ;;  %1321 = vmatmul.mubr.f32.gmra.mxu1 %v219_v49  ;;  %v714_v50 = vld [vmem:[%s2030_s5 + $0xc0] sm:$0xff] }
  0xfb   :  { %v208_v52 = vpop.f32.mrf.mxu0  ;;  %1323 = vmatprep.mubr.msk.f32.mxu1 %vm1527_vm2, %v1526_v2 }
  0xfc   :  { %v220_v53 = vmax.f32 %v207_v51, 0.0  ;;  %v803_v51 = vld [vmem:[%s2030_s5 + $0x138] sm:$0xff]  ;;  %v802_v52 = vld [vmem:[%s2030_s5 + $0x130] sm:$0xff] }
  0xfd   :  { %v211_v54 = vpop.f32.mrf.mxu0 }
  0xfe   :  { %v212_v55 = vadd.f32 %v1137_v37, %v211_v54  ;;  %1324 = vmatmul.mubr.f32.gmra.mxu1 %v220_v53  ;;  %v720_v37 = vld [vmem:[%s2030_s5 + $0xf0] sm:$0xff]  ;;  %v885_v53 = vld [vmem:[%s2030_s5 + $0x178] sm:$0xff]  ;;  %v801_v54 = vld [vmem:[%s2030_s5 + $0x128] sm:$0xff] }
  0xff   :  { %v213_v56 = vpop.f32.mrf.mxu0  ;;  %1326 = vmatprep.mubr.msk.f32.mxu1 %vm1527_vm2, %v1526_v2 }
 0x100   :  { %v221_v57 = vmax.f32 %v212_v55, 0.0  ;;  %v884_v55 = vld [vmem:[%s2030_s5 + $0x170] sm:$0xff]  ;;  %v800_v56 = vld [vmem:[%s2030_s5 + $0x120] sm:$0xff] }
 0x101   :  { %v214_v58 = vpop.f32.mrf.mxu0 }
 0x102   :  { %1327 = vmatmul.mubr.f32.gmra.mxu1 %v221_v57  ;;  %v883_v57 = vld [vmem:[%s2030_s5 + $0x168] sm:$0xff]  ;;  %v799_v58 = vld [vmem:[%s2030_s5 + $0x118] sm:$0xff] }
 0x103   :  { %v215_v59 = vpop.f32.mrf.mxu0  ;;  %1339 = vmatprep.mubr.msk.f32.mxu1 %vm147_vm0, %v328_v60  ;;  %v798_v60 = vld [vmem:[%s2030_s5 + $0x110] sm:$0xff] }
 0x104   :  { %v882_v59 = vld [vmem:[%s2030_s5 + $0x160] sm:$0xff] }
 0x1b2   :  { %v304_v6 = vpop.f32.mrf.mxu1 }
 0x1b4   :  { %v1316_v7 = vpop.f32.mrf.mxu1 }
 0x1b5   :  { %v966_v7 = vld [vmem:[%s2030_s5 + $0x1b0] sm:$0xff] }
 0x1b6   :  { %v309_v8 = vpop.f32.mrf.mxu1 }
 0x1b8   :  { %v1319_v9 = vpop.f32.mrf.mxu1 }
 0x1b9   :  { %v965_v9 = vld [vmem:[%s2030_s5 + $0x1a8] sm:$0xff] }
 0x1ba   :  { %v314_v10 = vpop.f32.mrf.mxu1 }
 0x1bc   :  { %v1322_v11 = vpop.f32.mrf.mxu1 }
 0x1bd   :  { %v964_v11 = vld [vmem:[%s2030_s5 + $0x1a0] sm:$0xff] }
 0x1be   :  { %v319_v12 = vpop.f32.mrf.mxu1 }
 0x1c0   :  { %v1325_v13 = vpop.f32.mrf.mxu1 }
 0x1c1   :  { %v963_v13 = vld [vmem:[%s2030_s5 + $0x198] sm:$0xff] }
 0x1c2   :  { %v324_v14 = vpop.f32.mrf.mxu1 }
 0x1c3   :  { %1329 = vmatprep.subr.msk.mxu1 %vm360_vm3, %v324_v14 }
 0x1c4   :  { %v1328_v15 = vpop.f32.mrf.mxu1  ;;  %1330 = vmatpush3.msk.msra.mxu1 %vm360_vm3, %v324_v14  ;;  %v1046_v14 = vld [vmem:[%s2030_s5 + $0x1e0] sm:$0xff] }
 0x1c5   :  { %1331 = vmatprep.subr.mxu1 %v319_v12  ;;  %v962_v15 = vld [vmem:[%s2030_s5 + $0x190] sm:$0xff] }
 0x1c6   :  { %1332 = vmatpush3.msra.mxu1 %v319_v12  ;;  %v1047_v12 = vld [vmem:[%s2030_s5 + $0x1e8] sm:$0xff] }
 0x1c7   :  { %1333 = vmatprep.subr.mxu1 %v314_v10 }
 0x1c8   :  { %1334 = vmatpush3.msra.mxu1 %v314_v10  ;;  %v1048_v10 = vld [vmem:[%s2030_s5 + $0x1f0] sm:$0xff] }
 0x1c9   :  { %1335 = vmatprep.subr.mxu1 %v309_v8 }
 0x1ca   :  { %1336 = vmatpush3.msra.mxu1 %v309_v8  ;;  %v1049_v8 = vld [vmem:[%s2030_s5 + $0x1f8] sm:$0xff] }
 0x1cb   :  { %1337 = vmatprep.subr.mxu1 %v304_v6 }
 0x1cc   :  { %1338 = vmatpush3.msra.mxu1 %v304_v6  ;;  %v967_v6 = vld [vmem:[%s2030_s5 + $0x1b8] sm:$0xff] }
 0x1cd   :  { %1340 = vmatmul.mubr.msk.f32.vlgmr.msra.gmra.mxu1 %vm147_vm0, %v329_v16  ;;  %1370 = vmatprep.subr.mxu1 %v1526_v2  ;;  %v1045_v16 = vld [vmem:[%s2030_s5 + $0x1d8] sm:$0xff] }
 0x1ce   :  { %1342 = vmatprep.mubr.msk.f32.mxu1 %vm147_vm0, %v330_v17  ;;  %1371 = vmatpush3.msra.mxu1 %v476_v18  ;;  %v961_v17 = vld [vmem:[%s2030_s5 + $0x188] sm:$0xff]  ;;  %v1044_v18 = vld [vmem:[%s2030_s5 + $0x1d0] sm:$0xff] }
 0x1cf   :  { %1372 = vmatprep.subr.mxu1 %v1526_v2 }
 0x1d0   :  { %1373 = vmatpush3.msra.mxu1 %v475_v19 }
 0x1d1   :  { %1343 = vmatmul.mubr.msk.f32.gmra.mxu1 %vm147_vm0, %v331_v20  ;;  %1374 = vmatprep.subr.mxu1 %v1526_v2  ;;  %v960_v20 = vld [vmem:[%s2030_s5 + $0x180] sm:$0xff] }
 0x1d2   :  { %1345 = vmatprep.mubr.msk.f32.mxu1 %vm147_vm0, %v332_v21  ;;  %1375 = vmatpush3.msra.mxu1 %v474_v22  ;;  %v1043_v21 = vld [vmem:[%s2030_s5 + $0x1c8] sm:$0xff]  ;;  %v1042_v22 = vld [vmem:[%s2030_s5 + $0x1c0] sm:$0xff] }
 0x1d3   :  { %1376 = vmatprep.subr.mxu1 %v1526_v2 }
 0x1d4   :  { %1377 = vmatpush3.msra.mxu1 %v473_v23 }
 0x1d5   :  { %1346 = vmatmul.mubr.msk.f32.gmra.mxu1 %vm147_vm0, %v333_v24  ;;  %1378 = vmatprep.subr.mxu1 %v1526_v2 }
 0x1d6   :  { %1348 = vmatprep.mubr.msk.f32.mxu1 %vm147_vm0, %v334_v25  ;;  %1379 = vmatpush3.msra.mxu1 %v472_v26 }
 0x1d7   :  { %1380 = vmatprep.subr.mxu1 %v1526_v2 }
 0x1d8   :  { %1381 = vmatpush3.msra.mxu1 %v471_v27 }
 0x1d9   :  { %1349 = vmatmul.mubr.msk.f32.gmra.mxu1 %vm147_vm0, %v335_v28  ;;  %1382 = vmatprep.subr.mxu1 %v1526_v2 }
 0x1da   :  { %1383 = vmatpush3.msra.mxu1 %v470_v29  ;;  %1386 = vmatprep.mubr.msk.f32.mxu1 %vm1527_vm2, %v1526_v2 }
 0x1db   :  { %1384 = vmatprep.subr.mxu1 %v1526_v2 }
 0x1dc   :  { %1385 = vmatpush3.msra.mxu1 %v469_v30 }
 0x1dd   :  { %1408 = vmatprep.subr.mxu1 %v1526_v2 }
 0x28d   :  { %v1341_v32 = vpop.f32.mrf.mxu1 }
 0x28e   :  { %1368 = vmatmul.mubr.msk.f32.vlgmr.msra.gmra.mxu0 %vm485_vm4, %v1341_v32 }
 0x28f   :  { %1390 = vmatpush3.msra.mxu0 %v639_v31  ;;  %v430_v35 = vpop.f32.mrf.mxu1  ;;  %1405 = vmatprep.mubr.msk.f32.mxu0 %vm1527_vm2, %v1526_v2 }
 0x290   :  { %1391 = vmatprep.subr.mxu0 %v1526_v2  ;;  %1387 = vmatmul.mubr.msk.f32.vlgmr.msra.gmra.mxu1 %vm485_vm4, %v430_v35 }
 0x291   :  { %1392 = vmatpush3.msra.mxu0 %v638_v33  ;;  %1409 = vmatpush3.msra.mxu1 %v721_v34  ;;  %v1344_v44 = vpop.f32.mrf.mxu1 }
 0x292   :  { %1393 = vmatprep.subr.mxu0 %v1526_v2  ;;  %1410 = vmatprep.subr.mxu1 %v1526_v2 }
 0x293   :  { %1394 = vmatpush3.msra.mxu0 %v637_v36  ;;  %1411 = vmatpush3.msra.mxu1 %v720_v37  ;;  %v440_v49 = vpop.f32.mrf.mxu1 }
 0x294   :  { %1395 = vmatprep.subr.mxu0 %v1526_v2  ;;  %1412 = vmatprep.subr.mxu1 %v1526_v2 }
 0x295   :  { %1396 = vmatpush3.msra.mxu0 %v636_v38  ;;  %1413 = vmatpush3.msra.mxu1 %v719_v39  ;;  %v1347_v62 = vpop.f32.mrf.mxu1 }
 0x296   :  { %1397 = vmatprep.subr.mxu0 %v1526_v2  ;;  %1414 = vmatprep.subr.mxu1 %v1526_v2 }
 0x297   :  { %1398 = vmatpush3.msra.mxu0 %v635_v40  ;;  %1415 = vmatpush3.msra.mxu1 %v718_v41  ;;  %v450_v4 = vpop.f32.mrf.mxu1 }
 0x298   :  { %1399 = vmatprep.subr.mxu0 %v1526_v2  ;;  %1416 = vmatprep.subr.mxu1 %v1526_v2 }
 0x299   :  { %1400 = vmatpush3.msra.mxu0 %v634_v42  ;;  %1417 = vmatpush3.msra.mxu1 %v717_v43  ;;  %v1350_v19 = vpop.f32.mrf.mxu1  ;;  %v1175_v43 = vld [vmem:[%s2031_s6] ss:$0 sm:$0xff] }
 0x29a   :  { %1401 = vmatprep.subr.mxu0 %v1526_v2  ;;  %1418 = vmatprep.subr.mxu1 %v1526_v2 }
 0x29b   :  { %1402 = vmatpush3.msra.mxu0 %v633_v45  ;;  %1419 = vmatpush3.msra.mxu1 %v716_v46  ;;  %v460_v23 = vpop.f32.mrf.mxu1 }
 0x29c   :  { %1403 = vmatprep.subr.mxu0 %v1526_v2  ;;  %1420 = vmatprep.subr.mxu1 %v1526_v2 }
 0x29d   :  { %1404 = vmatpush3.msra.mxu0 %v632_v47  ;;  %1421 = vmatpush3.msra.mxu1 %v715_v48 }
 0x29e   :  { %1406 = vmatmul.mubr.msk.f32.vlgmr.msra.gmra.mxu0 %vm485_vm4, %v440_v49  ;;  %1422 = vmatprep.subr.mxu1 %v1526_v2 }
 0x29f   :  { %1427 = vmatprep.subr.mxu0 %v1526_v2  ;;  %1423 = vmatpush3.msra.mxu1 %v714_v50 }
 0x2a0   :  { %1424 = vmatprep.mubr.msk.f32.mxu1 %vm1527_vm2, %v1526_v2  ;;  %1428 = vmatpush3.msra.mxu0 %v803_v51 }
 0x2a1   :  { %1425 = vmatmul.mubr.msk.f32.vlgmr.msra.gmra.mxu1 %vm485_vm4, %v1344_v44  ;;  %1429 = vmatprep.subr.mxu0 %v1526_v2 }
 0x2a2   :  { %1446 = vmatprep.subr.mxu1 %v1526_v2  ;;  %1430 = vmatpush3.msra.mxu0 %v802_v52 }
 0x2a3   :  { %1447 = vmatpush3.msra.mxu1 %v885_v53  ;;  %1431 = vmatprep.subr.mxu0 %v1526_v2 }
 0x2a4   :  { %1448 = vmatprep.subr.mxu1 %v1526_v2  ;;  %1432 = vmatpush3.msra.mxu0 %v801_v54 }
 0x2a5   :  { %1449 = vmatpush3.msra.mxu1 %v884_v55  ;;  %1433 = vmatprep.subr.mxu0 %v1526_v2 }
 0x2a6   :  { %1450 = vmatprep.subr.mxu1 %v1526_v2  ;;  %1434 = vmatpush3.msra.mxu0 %v800_v56 }
 0x2a7   :  { %1451 = vmatpush3.msra.mxu1 %v883_v57  ;;  %1435 = vmatprep.subr.mxu0 %v1526_v2 }
 0x2a8   :  { %1452 = vmatprep.subr.mxu1 %v1526_v2  ;;  %1436 = vmatpush3.msra.mxu0 %v799_v58 }
 0x2a9   :  { %1453 = vmatpush3.msra.mxu1 %v882_v59  ;;  %1437 = vmatprep.subr.mxu0 %v1526_v2 }
 0x2aa   :  { %1454 = vmatprep.subr.mxu1 %v1526_v2  ;;  %1438 = vmatpush3.msra.mxu0 %v798_v60 }
 0x2ab   :  { %1455 = vmatpush3.msra.mxu1 %v881_v61  ;;  %1439 = vmatprep.subr.mxu0 %v1526_v2 }
 0x2ac   :  { %1456 = vmatprep.subr.mxu1 %v1526_v2  ;;  %1440 = vmatpush3.msra.mxu0 %v797_v63 }
 0x2ad   :  { %1457 = vmatpush3.msra.mxu1 %v880_v0  ;;  %1441 = vmatprep.subr.mxu0 %v1526_v2 }
 0x2ae   :  { %1458 = vmatprep.subr.mxu1 %v1526_v2  ;;  %1442 = vmatpush3.msra.mxu0 %v796_v1 }
 0x2af   :  { %1443 = vmatprep.mubr.msk.f32.mxu0 %vm1527_vm2, %v1526_v2  ;;  %1459 = vmatpush3.msra.mxu1 %v879_v3 }
 0x2b0   :  { %1444 = vmatmul.mubr.msk.f32.vlgmr.msra.gmra.mxu0 %vm485_vm4, %v450_v4  ;;  %1460 = vmatprep.subr.mxu1 %v1526_v2 }
 0x2b1   :  { %1465 = vmatprep.subr.mxu0 %v1526_v2  ;;  %1461 = vmatpush3.msra.mxu1 %v878_v5 }
 0x2b2   :  { %1462 = vmatprep.mubr.msk.f32.mxu1 %vm1527_vm2, %v1526_v2  ;;  %1466 = vmatpush3.msra.mxu0 %v967_v6 }
 0x2b3   :  { %1463 = vmatmul.mubr.msk.f32.vlgmr.msra.gmra.mxu1 %vm485_vm4, %v1347_v62  ;;  %1467 = vmatprep.subr.mxu0 %v1526_v2 }
 0x2b4   :  { %1484 = vmatprep.subr.mxu1 %v1526_v2  ;;  %1468 = vmatpush3.msra.mxu0 %v966_v7 }
 0x2b5   :  { %1485 = vmatpush3.msra.mxu1 %v1049_v8  ;;  %1469 = vmatprep.subr.mxu0 %v1526_v2 }
 0x2b6   :  { %1486 = vmatprep.subr.mxu1 %v1526_v2  ;;  %1470 = vmatpush3.msra.mxu0 %v965_v9 }
 0x2b7   :  { %1487 = vmatpush3.msra.mxu1 %v1048_v10  ;;  %1471 = vmatprep.subr.mxu0 %v1526_v2 }
 0x2b8   :  { %1488 = vmatprep.subr.mxu1 %v1526_v2  ;;  %1472 = vmatpush3.msra.mxu0 %v964_v11 }
 0x2b9   :  { %1489 = vmatpush3.msra.mxu1 %v1047_v12  ;;  %1473 = vmatprep.subr.mxu0 %v1526_v2 }
 0x2ba   :  { %1490 = vmatprep.subr.mxu1 %v1526_v2  ;;  %1474 = vmatpush3.msra.mxu0 %v963_v13 }
 0x2bb   :  { %1491 = vmatpush3.msra.mxu1 %v1046_v14  ;;  %1475 = vmatprep.subr.mxu0 %v1526_v2 }
 0x2bc   :  { %1492 = vmatprep.subr.mxu1 %v1526_v2  ;;  %1476 = vmatpush3.msra.mxu0 %v962_v15 }
 0x2bd   :  { %1493 = vmatpush3.msra.mxu1 %v1045_v16  ;;  %1477 = vmatprep.subr.mxu0 %v1526_v2 }
 0x2be   :  { %1494 = vmatprep.subr.mxu1 %v1526_v2  ;;  %1478 = vmatpush3.msra.mxu0 %v961_v17 }
 0x2bf   :  { %1495 = vmatpush3.msra.mxu1 %v1044_v18  ;;  %1479 = vmatprep.subr.mxu0 %v1526_v2 }
 0x2c0   :  { %1496 = vmatprep.subr.mxu1 %v1526_v2  ;;  %1480 = vmatpush3.msra.mxu0 %v960_v20 }
 0x2c1   :  { %1481 = vmatprep.mubr.msk.f32.mxu0 %vm1527_vm2, %v1526_v2  ;;  %1497 = vmatpush3.msra.mxu1 %v1043_v21 }
 0x2c2   :  { %1482 = vmatmul.mubr.msk.f32.vlgmr.msra.gmra.mxu0 %vm485_vm4, %v460_v23  ;;  %1498 = vmatprep.subr.mxu1 %v1526_v2 }
 0x2c3   :  { %1499 = vmatpush3.msra.mxu1 %v1042_v22  ;;  %1500 = vmatprep.mubr.msk.f32.mxu1 %vm1527_vm2, %v1526_v2 }
 0x2c4   :  { %1501 = vmatmul.mubr.msk.f32.vlgmr.msra.gmra.mxu1 %vm485_vm4, %v1350_v19 }
 0x34e   :  { %v555_v24 = vpop.f32.mrf.mxu0 }
 0x350   :  { %v628_v25 = vpop.f32.mrf.mxu1  ;;  %v1369_v26 = vpop.f32.mrf.mxu0 }
 0x351   :  { %v629_v35 = vadd.f32 %v628_v25, %v555_v24 }
 0x352   :  { %v1388_v27 = vpop.f32.mrf.mxu1 }
 0x35e   :  { %v709_v28 = vpop.f32.mrf.mxu0 }
 0x35f   :  { %v713_v37 = vadd.f32 %v709_v28, %v629_v35 }
 0x360   :  { %v1407_v29 = vpop.f32.mrf.mxu0 }
 0x361   :  { %v791_v30 = vpop.f32.mrf.mxu1 }
 0x362   :  { %v795_v38 = vadd.f32 %v791_v30, %v713_v37 }
 0x363   :  { %v1426_v31 = vpop.f32.mrf.mxu1 }
 0x370   :  { %v873_v32 = vpop.f32.mrf.mxu0 }
 0x371   :  { %v877_v39 = vadd.f32 %v873_v32, %v795_v38 }
 0x372   :  { %v1445_v33 = vpop.f32.mrf.mxu0 }
 0x373   :  { %v955_v34 = vpop.f32.mrf.mxu1 }
 0x374   :  { %v959_v40 = vadd.f32 %v955_v34, %v877_v39 }
 0x375   :  { %v1464_v36 = vpop.f32.mrf.mxu1 }
 0x382   :  { %v1037_v2 = vpop.f32.mrf.mxu0 }
 0x383   :  { %v1041_v41 = vadd.f32 %v1037_v2, %v959_v40 }
 0x384   :  { %v1119_v42 = vpop.f32.mrf.mxu1  ;;  %v1483_v44 = vpop.f32.mrf.mxu0 }
 0x385   :  { %v1123_v45 = vadd.f32 %v1119_v42, %v1041_v41 }
 0x386   :  { %v1502_v46 = vpop.f32.mrf.mxu1 }
 0x387   :  { %v1131_v47 = vadd.f32 %v1175_v43, %v1123_v45 }
 0x389   :  { %1132 = vst [vmem:[%s2032_s7] sm:$0xff] %v1131_v47 }

</bundles_post_ra>
